<compile_context>
chip_gen: v5e
topology: v5e:2x2
jax: 0.10.0
libtpu: 0.0.40
codegen_flags: <defaults>
</compile_context>

<pallas_src>
import functools

import jax
import jax.numpy as jnp
from jax.experimental import pallas as pl
from jax.experimental.pallas import tpu as pltpu


# ----------------------------------------------------------------------------
# Kernel
# ----------------------------------------------------------------------------
def _triplet_kernel(a_ref, p_ref, n_ref, out_ref, acc_ref, *,
                    margin, batch, dim, tile_b, tile_d, mask_rows, mask_cols):
    i = pl.program_id(0)              # batch-tile index ("parallel")
    d = pl.program_id(1)              # embedding-dim tile index ("arbitrary")
    nd = pl.num_programs(1)

    # Upcast to f32 (bf16 inputs supported; arithmetic stays f32 everywhere).
    a = a_ref[...].astype(jnp.float32)
    p = p_ref[...].astype(jnp.float32)
    n = n_ref[...].astype(jnp.float32)

    dpos = a - p
    dneg = a - n
    # distance_positive - distance_negative folded into ONE axis-1 reduce:
    #   sum((a-p)^2 - (a-n)^2, axis=1)
    diff = dpos * dpos - dneg * dneg                       # (tile_b, tile_d), VPU

    if mask_cols:
        # Ragged D tile: zero padded lanes before the reduce (select does not
        # propagate NaN/Inf from the garbage-padded region).
        col = d * tile_d + jax.lax.broadcasted_iota(jnp.int32, diff.shape, 1)
        diff = jnp.where(col < dim, diff, jnp.float32(0.0))

    partial = jnp.sum(diff, axis=1, keepdims=True)         # (tile_b, 1), one XLU reduce

    @pl.when(d == 0)
    def _():
        acc_ref[...] = jnp.zeros_like(acc_ref)

    acc_ref[...] = acc_ref[...] + partial

    @pl.when(d == nd - 1)
    def _():
        losses = jnp.maximum(acc_ref[...] + jnp.float32(margin), jnp.float32(0.0))
        if mask_rows:
            # Ragged batch tile: padded-row reads were garbage; zero them so the
            # wrapper's sum is exact (OOB writes are dropped anyway).
            row = i * tile_b + jax.lax.broadcasted_iota(jnp.int32, losses.shape, 0)
            losses = jnp.where(row < batch, losses, jnp.float32(0.0))
        out_ref[...] = losses


# ----------------------------------------------------------------------------
# Tiling / hardware planning
# ----------------------------------------------------------------------------
def _round_up(x, m):
    return ((x + m - 1) // m) * m


def _vmem_capacity_bytes():
    """Physical VMEM per TensorCore, with conservative fallbacks."""
    try:
        info = pltpu.get_tpu_info()
        for name in ("vmem_capacity_bytes", "vmem_bytes", "vmem_size_bytes"):
            v = getattr(info, name, None)
            if isinstance(v, int) and v > 0:
                return v
    except Exception:
        pass
    try:
        kind = jax.devices()[0].device_kind.lower()
        if "v4" in kind or "v5" in kind or "v6" in kind:
            return 128 * 1024 * 1024
    except Exception:
        pass
    return 64 * 1024 * 1024  # safe (v7x-sized) default


def _budgets():
    cap = _vmem_capacity_bytes()
    if cap >= 100 * 1024 * 1024:          # v4/v5e/v6e: 128 MiB physical VMEM
        return 56 * 1024 * 1024, 100 * 1024 * 1024
    # v7x: 64 MiB physical VMEM per TensorCore
    return 28 * 1024 * 1024, 48 * 1024 * 1024


def _plan_tiles(B, D, itemsize, sub, input_budget_bytes):
    """Largest tiles fitting 3 inputs x 2 pipeline buffers in the budget."""
    bytes_per_full_row = 3 * 2 * D * itemsize
    t = input_budget_bytes // max(bytes_per_full_row, 1)
    t = (t // sub) * sub
    if t >= sub:
        # Full embedding dim per tile; tile only the batch.
        return int(min(t, _round_up(B, sub))), int(D)
    # Embedding dim too large for even `sub` full rows: tile D as well.
    tile_b = sub
    td = input_budget_bytes // (3 * 2 * tile_b * itemsize)
    td = max(128, (td // 128) * 128)
    tile_d = min(td, _round_up(D, 128))
    return int(tile_b), int(tile_d)


# ----------------------------------------------------------------------------
# Reference and wrapper
# ----------------------------------------------------------------------------
def triplet_loss_ref(anchor, positive, negative, margin=1.0, size_average=True):
    dp = jnp.sum((anchor - positive) ** 2, axis=1)
    dn = jnp.sum((anchor - negative) ** 2, axis=1)
    losses = jnp.maximum(dp - dn + margin, 0.0)
    return jnp.mean(losses) if size_average else jnp.sum(losses)


def triplet_loss(anchor, positive, negative, margin=1.0, size_average=True,
                 tile_b=None, tile_d=None, force_pallas=False):
    """Pallas equivalent of TripletLoss.forward. Inputs are (B, D)."""
    B, D = anchor.shape
    assert positive.shape == (B, D) and negative.shape == (B, D)
    itemsize = jnp.dtype(anchor.dtype).itemsize
    sub = max(8, 32 // itemsize)          # packed sublane multiple per dtype

    # Tiny problems: a single XLA fusion beats a pallas_call launch.
    if not force_pallas and 3 * B * D * itemsize < 2 * 1024 * 1024:
        return triplet_loss_ref(anchor, positive, negative, margin, size_average)

    input_budget, vmem_limit = _budgets()
    auto_tb, auto_td = _plan_tiles(B, D, itemsize, sub, input_budget)

    if tile_b is None:
        tile_b = auto_tb
    else:
        tile_b = max(sub, (int(tile_b) // sub) * sub)
        tile_b = min(tile_b, _round_up(B, sub))

    if tile_d is None:
        tile_d = auto_td
    elif int(tile_d) >= D or D <= 128:
        tile_d = D
    else:
        tile_d = max(128, (int(tile_d) // 128) * 128)

    grid_b = pl.cdiv(B, tile_b)
    grid_d = pl.cdiv(D, tile_d)
    mask_rows = (grid_b * tile_b != B)    # ragged batch tile (no wrapper pad)
    mask_cols = (grid_d * tile_d != D)    # ragged embedding-dim tile

    kernel = functools.partial(
        _triplet_kernel, margin=float(margin), batch=B, dim=D,
        tile_b=tile_b, tile_d=tile_d, mask_rows=mask_rows, mask_cols=mask_cols)

    emb_spec = pl.BlockSpec((tile_b, tile_d), lambda i, d: (i, d))

    per_row = pl.pallas_call(
        kernel,
        out_shape=jax.ShapeDtypeStruct((B, 1), jnp.float32),
        grid_spec=pltpu.PrefetchScalarGridSpec(
            num_scalar_prefetch=0,
            grid=(grid_b, grid_d),
            in_specs=[emb_spec, emb_spec, emb_spec],
            out_specs=pl.BlockSpec((tile_b, 1), lambda i, d: (i, 0)),
            scratch_shapes=[pltpu.VMEM((tile_b, 1), jnp.float32)],
        ),
        compiler_params=pltpu.CompilerParams(
            # Batch tiles are independent (sharded across TCs on v7x); the
            # embedding-dim axis carries the accumulator.
            dimension_semantics=("parallel", "arbitrary"),
            vmem_limit_bytes=vmem_limit,
        ),
    )(anchor, positive, negative)

    total = jnp.sum(per_row)
    return total / jnp.float32(B) if size_average else total
    # TODO(synk): the PyTorch try/except-print-exit error path is host-side
    # control flow with no Pallas equivalent; only the loss math is implemented.


# ----------------------------------------------------------------------------
# Self-test
# ----------------------------------------------------------------------------
if __name__ == "__main__":
    key = jax.random.PRNGKey(0)
    k_a, k_p, k_n = jax.random.split(key, 3)

    # 1) f32, divisible batch, mean reduction.
    B, D = 64, 256
    a = jax.random.normal(k_a, (B, D), dtype=jnp.float32)
    p = jax.random.normal(k_p, (B, D), dtype=jnp.float32)
    n = jax.random.normal(k_n, (B, D), dtype=jnp.float32)
    out1 = jax.block_until_ready(
        triplet_loss(a, p, n, margin=1.0, size_average=True, force_pallas=True))
    ref1 = triplet_loss_ref(a, p, n, 1.0, True)
    assert jnp.allclose(out1, ref1, rtol=1e-5, atol=1e-5), (out1, ref1)

    # 2) Ragged batch (partial last block, no wrapper-side padding), sum.
    B2 = 50
    out2 = jax.block_until_ready(
        triplet_loss(a[:B2], p[:B2], n[:B2], margin=0.5, size_average=False,
                     force_pallas=True, tile_b=32))
    ref2 = triplet_loss_ref(a[:B2], p[:B2], n[:B2], 0.5, False)
    assert jnp.allclose(out2, ref2, rtol=1e-5, atol=1e-4), (out2, ref2)

    # 3) bf16 inputs (tile_b rounded to the 16-row packed sublane multiple).
    ab, pb, nb = (a.astype(jnp.bfloat16), p.astype(jnp.bfloat16),
                  n.astype(jnp.bfloat16))
    out3 = jax.block_until_ready(
        triplet_loss(ab, pb, nb, margin=1.0, size_average=True, force_pallas=True))
    ref3 = triplet_loss_ref(ab.astype(jnp.float32), pb.astype(jnp.float32),
                            nb.astype(jnp.float32), 1.0, True)
    assert jnp.allclose(out3, ref3, rtol=1e-4, atol=1e-4), (out3, ref3)

    # 4) Forced D-tiling path (accumulator over the "arbitrary" axis, ragged
    #    in both batch and embedding dim).
    B4, D4 = 40, 320
    a4 = jax.random.normal(k_a, (B4, D4), dtype=jnp.float32)
    p4 = jax.random.normal(k_p, (B4, D4), dtype=jnp.float32)
    n4 = jax.random.normal(k_n, (B4, D4), dtype=jnp.float32)
    out4 = jax.block_until_ready(
        triplet_loss(a4, p4, n4, margin=1.0, size_average=False,
                     force_pallas=True, tile_b=16, tile_d=128))
    ref4 = triplet_loss_ref(a4, p4, n4, 1.0, False)
    assert jnp.allclose(out4, ref4, rtol=1e-5, atol=1e-3), (out4, ref4)

    print("KERNEL_OK")
</pallas_src>

<mosaic_0001>
module attributes {stable_mosaic.version = 11 : i64} {
  func.func @_triplet_kernel(%arg0: i32, %arg1: i32, %arg2: memref<64x256xf32, #tpu.memory_space<vmem>>, %arg3: memref<64x256xf32, #tpu.memory_space<vmem>>, %arg4: memref<64x256xf32, #tpu.memory_space<vmem>>, %arg5: memref<64x1xf32, #tpu.memory_space<vmem>>, %arg6: memref<64x1xf32, #tpu.memory_space<vmem>>) attributes {dimension_semantics = [#tpu.dimension_semantics<parallel>, #tpu.dimension_semantics<arbitrary>], iteration_bounds = array<i64: 1, 1>, scalar_prefetch = 0 : i64, scratch_operands = 1 : i64, tpu.core_type = #tpu.core_type<tc>, window_params = [{transform_indices = @transform_0, window_bounds = array<i64: 64, 256>}, {transform_indices = @transform_1, window_bounds = array<i64: 64, 256>}, {transform_indices = @transform_2, window_bounds = array<i64: 64, 256>}, {transform_indices = @transform_3, window_bounds = array<i64: 64, 1>}]} {
    %c0 = arith.constant 0 : index
    %c0_0 = arith.constant 0 : index
    %0 = vector.load %arg2[%c0, %c0_0] : memref<64x256xf32, #tpu.memory_space<vmem>>, vector<64x256xf32>
    %c0_1 = arith.constant 0 : index
    %c0_2 = arith.constant 0 : index
    %1 = vector.load %arg3[%c0_1, %c0_2] : memref<64x256xf32, #tpu.memory_space<vmem>>, vector<64x256xf32>
    %c0_3 = arith.constant 0 : index
    %c0_4 = arith.constant 0 : index
    %2 = vector.load %arg4[%c0_3, %c0_4] : memref<64x256xf32, #tpu.memory_space<vmem>>, vector<64x256xf32>
    %3 = arith.subf %0, %1 : vector<64x256xf32>
    %4 = arith.subf %0, %2 : vector<64x256xf32>
    %5 = arith.mulf %3, %3 : vector<64x256xf32>
    %6 = arith.mulf %4, %4 : vector<64x256xf32>
    %7 = arith.subf %5, %6 : vector<64x256xf32>
    %cst = arith.constant dense<0.000000e+00> : vector<64xf32>
    %8 = vector.multi_reduction <add>, %7, %cst [1] : vector<64x256xf32> to vector<64xf32>
    %9 = vector.shape_cast %8 : vector<64xf32> to vector<64x1xf32>
    %c0_i32 = arith.constant 0 : i32
    %10 = arith.cmpi eq, %arg1, %c0_i32 : i32
    %11 = arith.extui %10 : i1 to i32
    %c0_i32_5 = arith.constant 0 : i32
    %12 = arith.cmpi ne, %11, %c0_i32_5 : i32
    scf.if %12 {
      %cst_12 = arith.constant 0.000000e+00 : f32
      %19 = vector.broadcast %cst_12 : f32 to vector<64x1xf32>
      %c0_13 = arith.constant 0 : index
      %c0_14 = arith.constant 0 : index
      %20 = vector.load %arg6[%c0_13, %c0_14] : memref<64x1xf32, #tpu.memory_space<vmem>>, vector<64x1xf32>
      tpu.vector_store %arg6[%c0_13, %c0_14], %19 {strides = array<i32>} : memref<64x1xf32, #tpu.memory_space<vmem>>, vector<64x1xf32>,
    } else {
    }
    %c0_6 = arith.constant 0 : index
    %c0_7 = arith.constant 0 : index
    %13 = vector.load %arg6[%c0_6, %c0_7] : memref<64x1xf32, #tpu.memory_space<vmem>>, vector<64x1xf32>
    %14 = arith.addf %13, %9 : vector<64x1xf32>
    %c0_8 = arith.constant 0 : index
    %c0_9 = arith.constant 0 : index
    %15 = vector.load %arg6[%c0_8, %c0_9] : memref<64x1xf32, #tpu.memory_space<vmem>>, vector<64x1xf32>
    tpu.vector_store %arg6[%c0_8, %c0_9], %14 {strides = array<i32>} : memref<64x1xf32, #tpu.memory_space<vmem>>, vector<64x1xf32>,
    %c0_i32_10 = arith.constant 0 : i32
    %16 = arith.cmpi eq, %arg1, %c0_i32_10 : i32
    %17 = arith.extui %16 : i1 to i32
    %c0_i32_11 = arith.constant 0 : i32
    %18 = arith.cmpi ne, %17, %c0_i32_11 : i32
    scf.if %18 {
      %c0_12 = arith.constant 0 : index
      %c0_13 = arith.constant 0 : index
      %19 = vector.load %arg6[%c0_12, %c0_13] : memref<64x1xf32, #tpu.memory_space<vmem>>, vector<64x1xf32>
      %cst_14 = arith.constant 1.000000e+00 : f32
      %20 = vector.broadcast %cst_14 : f32 to vector<64x1xf32>
      %21 = arith.addf %19, %20 : vector<64x1xf32>
      %cst_15 = arith.constant 0.000000e+00 : f32
      %22 = vector.broadcast %cst_15 : f32 to vector<64x1xf32>
      %23 = arith.maximumf %21, %22 : vector<64x1xf32>
      %c0_16 = arith.constant 0 : index
      %c0_17 = arith.constant 0 : index
      %24 = vector.load %arg5[%c0_16, %c0_17] : memref<64x1xf32, #tpu.memory_space<vmem>>, vector<64x1xf32>
      tpu.vector_store %arg5[%c0_16, %c0_17], %23 {strides = array<i32>} : memref<64x1xf32, #tpu.memory_space<vmem>>, vector<64x1xf32>,
    } else {
    }
    return
  }
  func.func @transform_0(%arg0: i32, %arg1: i32) -> (i32, i32) {
    %c0_i32 = arith.constant 0 : i32
    return %arg0, %arg1 : i32, i32
  }
  func.func @transform_1(%arg0: i32, %arg1: i32) -> (i32, i32) {
    %c0_i32 = arith.constant 0 : i32
    return %arg0, %arg1 : i32, i32
  }
  func.func @transform_2(%arg0: i32, %arg1: i32) -> (i32, i32) {
    %c0_i32 = arith.constant 0 : i32
    return %arg0, %arg1 : i32, i32
  }
  func.func @transform_3(%arg0: i32, %arg1: i32) -> (i32, i32) {
    %c0_i32 = arith.constant 0 : i32
    %c0_i32_0 = arith.constant 0 : i32
    return %arg0, %c0_i32 : i32, i32
  }
}

</mosaic_0001>

<bundles_post_ra>
// kernel: tpu_custom_call.1
= control target key start
LH: loop header
LB: loop body
LE: loop exit
PB: predicated region body
PF: predicated region fallthrough
CT: control target
= control target key end

     0   :  { %8 = vsyncpa [#allocation4], 0  ;;  %s457_s0 = inlined_call_operand.hbm [shape: f32[64,256], index: 0, kind: input, shape index: {}]   ;;  %s458_s1 = inlined_call_operand.hbm [shape: f32[64,256], index: 1, kind: input, shape index: {}]   ;;  %s459_s2 = inlined_call_operand.hbm [shape: f32[64,256], index: 2, kind: input, shape index: {}]   ;;  %s460_s3 = inlined_call_operand.vmem [shape: f32[64,1], index: 3, kind: output, shape index: {}]  }
   0x1   :  { %9 = vsyncpa [#allocation6], 0  ;;  %s27_s14 = sshll.u32 %s458_s1, 4  ;;  %s374_s15 = smov [#allocation5]   ;;  %s28_s14 = int_to_ptr.hbm [resolvable:$true] %s27_s14 }
   0x2   :  { %s29_s16 = sshll.u32 %s374_s15, 4  ;;  %s14_s19 = sshll.u32 %s457_s0, 4  ;;  %s30_s16 = int_to_ptr.vmem [resolvable:$true] %s29_s16  ;;  %s15_s19 = int_to_ptr.hbm [resolvable:$true] %s14_s19 }
   0x3   :  { %s375_s20 = smov 256   ;;  %s376_s21 = smov 16  }
   0x4   :  { %35 = dma.hbm_to_vmem [thread:$0]  %s28_s14, 2048, %s30_s16, [#allocation6], %s375_s20, %s375_s20, %s376_s21  }
   0x5   :  { %s377_s22 = smov [#allocation3]   ;;  %s40_s26 = sshll.u32 %s459_s2, 4  ;;  %s41_s26 = int_to_ptr.hbm [resolvable:$true] %s40_s26 }
   0x6   :  { %s16_s23 = sshll.u32 %s377_s22, 4  ;;  %s378_s1 = smov [#allocation7]   ;;  %s17_s23 = int_to_ptr.vmem [resolvable:$true] %s16_s23 }
   0x7   :  { %22 = dma.hbm_to_vmem [thread:$0]  %s15_s19, 2048, %s17_s23, [#allocation4], %s375_s20, %s375_s20, %s376_s21  }
   0x8   :  { %s42_s27 = sshll.u32 %s378_s1, 4  ;;  %s43_s27 = int_to_ptr.vmem [resolvable:$true] %s42_s27 }
   0x9   :  { %48 = dma.hbm_to_vmem [thread:$0]  %s41_s26, 2048, %s43_s27, [#allocation6], %s375_s20, %s375_s20, %s376_s21  }
   0xa   :  { %370 = dma.done.wait [#allocation4], 2048  }
   0xb   :  { %371 = vsyncadd [#allocation4], 4294965248 }
   0xc   :  { %372 = dma.done.wait [#allocation6], 4096  }
   0xd   :  { %373 = vsyncadd [#allocation6], 4294963200  ;;  %vm217_vm0 = vcmask 7168   ;;  %v379_v0 = vmov 0.0   ;;  %v65_v1 = vld [vmem:[#allocation3 + $0x20] sm:$0xff]  ;;  %v66_v2 = vld [vmem:[#allocation3 + $0x28] sm:$0xff] }
   0xe   :  { %220 = vst.msk [vmem:[#allocation2 + $0x10] sm:$0xff] %vm217_vm0, %v379_v0  ;;  %v81_v3 = vld [vmem:[#allocation5 + $0x20] sm:$0xff]  ;;  %v82_v4 = vld [vmem:[#allocation5 + $0x28] sm:$0xff]  ;;  %v67_v37 = vld [vmem:[#allocation3 + $0x30] sm:$0xff] }
   0xf   :  { %218 = vst.msk [vmem:[#allocation2] sm:$0xff] %vm217_vm0, %v379_v0  ;;  %v97_v5 = vld [vmem:[#allocation7 + $0x20] sm:$0xff]  ;;  %v98_v6 = vld [vmem:[#allocation7 + $0x28] sm:$0xff]  ;;  %v113_v7 = vsub.f32 %v65_v1, %v81_v3  ;;  %v114_v8 = vsub.f32 %v66_v2, %v82_v4  ;;  %v68_v38 = vld [vmem:[#allocation3 + $0x38] sm:$0xff] }
  0x10   :  { %219 = vst.msk [vmem:[#allocation2 + $0x8] sm:$0xff] %vm217_vm0, %v379_v0  ;;  %v129_v9 = vsub.f32 %v65_v1, %v97_v5  ;;  %v130_v10 = vsub.f32 %v66_v2, %v98_v6  ;;  %v61_v11 = vld [vmem:[#allocation3] sm:$0xff]  ;;  %v62_v12 = vld [vmem:[#allocation3 + $0x8] sm:$0xff]  ;;  %v83_v39 = vld [vmem:[#allocation5 + $0x30] sm:$0xff] }
  0x11   :  { %221 = vst.msk [vmem:[#allocation2 + $0x18] sm:$0xff] %vm217_vm0, %v379_v0  ;;  %v77_v13 = vld [vmem:[#allocation5] sm:$0xff]  ;;  %v145_v14 = vmul.f32 %v113_v7, %v113_v7  ;;  %v78_v15 = vld [vmem:[#allocation5 + $0x8] sm:$0xff]  ;;  %v146_v19 = vmul.f32 %v114_v8, %v114_v8  ;;  %v84_v44 = vld [vmem:[#allocation5 + $0x38] sm:$0xff]  ;;  %v115_v50 = vsub.f32 %v67_v37, %v83_v39 }
  0x12   :  { %222 = vst.msk [vmem:[#allocation2 + $0x20] sm:$0xff] %vm217_vm0, %v379_v0  ;;  %v93_v16 = vld [vmem:[#allocation7] sm:$0xff]  ;;  %v94_v17 = vld [vmem:[#allocation7 + $0x8] sm:$0xff]  ;;  %v109_v18 = vsub.f32 %v61_v11, %v77_v13  ;;  %v161_v20 = vmul.f32 %v129_v9, %v129_v9  ;;  %v162_v21 = vmul.f32 %v130_v10, %v130_v10  ;;  %v110_v22 = vsub.f32 %v62_v12, %v78_v15  ;;  %v99_v45 = vld [vmem:[#allocation7 + $0x30] sm:$0xff] }
  0x13   :  { %223 = vst.msk [vmem:[#allocation2 + $0x28] sm:$0xff] %vm217_vm0, %v379_v0  ;;  %v69_v23 = vld [vmem:[#allocation3 + $0x40] sm:$0xff]  ;;  %v70_v24 = vld [vmem:[#allocation3 + $0x48] sm:$0xff]  ;;  %v125_v26 = vsub.f32 %v61_v11, %v93_v16  ;;  %v126_v27 = vsub.f32 %v62_v12, %v94_v17  ;;  %v100_v46 = vld [vmem:[#allocation7 + $0x38] sm:$0xff]  ;;  %v116_v59 = vsub.f32 %v68_v38, %v84_v44  ;;  %v131_v60 = vsub.f32 %v67_v37, %v99_v45 }
  0x14   :  { %v85_v25 = vld [vmem:[#allocation5 + $0x40] sm:$0xff]  ;;  %224 = vst.msk [vmem:[#allocation2 + $0x30] sm:$0xff] %vm217_vm0, %v379_v0  ;;  %v141_v28 = vmul.f32 %v109_v18, %v109_v18  ;;  %v86_v29 = vld [vmem:[#allocation5 + $0x48] sm:$0xff]  ;;  %v177_v33 = vsub.f32 %v145_v14, %v161_v20  ;;  %v178_v34 = vsub.f32 %v146_v19, %v162_v21  ;;  %v142_v35 = vmul.f32 %v110_v22, %v110_v22  ;;  %v63_v51 = vld [vmem:[#allocation3 + $0x10] sm:$0xff] }
  0x15   :  { %v101_v30 = vld [vmem:[#allocation7 + $0x40] sm:$0xff]  ;;  %v102_v31 = vld [vmem:[#allocation7 + $0x48] sm:$0xff]  ;;  %v117_v32 = vsub.f32 %v69_v23, %v85_v25  ;;  %225 = vst.msk [vmem:[#allocation2 + $0x38] sm:$0xff] %vm217_vm0, %v379_v0  ;;  %v118_v36 = vsub.f32 %v70_v24, %v86_v29  ;;  %v157_v40 = vmul.f32 %v125_v26, %v125_v26  ;;  %v158_v41 = vmul.f32 %v126_v27, %v126_v27  ;;  %v79_v52 = vld [vmem:[#allocation5 + $0x10] sm:$0xff] }
  0x16   :  { %v133_v42 = vsub.f32 %v69_v23, %v101_v30  ;;  %v134_v43 = vsub.f32 %v70_v24, %v102_v31  ;;  %v195_v47 = vadd.f32 %v178_v34, %v177_v33  ;;  %v64_v57 = vld [vmem:[#allocation3 + $0x18] sm:$0xff]  ;;  %v132_v61 = vsub.f32 %v68_v38, %v100_v46  ;;  %v95_v63 = vld [vmem:[#allocation7 + $0x10] sm:$0xff]  ;;  %v73_v37 = vld [vmem:[#allocation3 + $0x60] sm:$0xff] }
  0x17   :  { %v149_v48 = vmul.f32 %v117_v32, %v117_v32  ;;  %v150_v49 = vmul.f32 %v118_v36, %v118_v36  ;;  %v173_v53 = vsub.f32 %v141_v28, %v157_v40  ;;  %v174_v54 = vsub.f32 %v142_v35, %v158_v41  ;;  %v80_v58 = vld [vmem:[#allocation5 + $0x18] sm:$0xff]  ;;  %v71_v5 = vld [vmem:[#allocation3 + $0x50] sm:$0xff]  ;;  %v89_v38 = vld [vmem:[#allocation5 + $0x60] sm:$0xff] }
  0x18   :  { %v165_v55 = vmul.f32 %v133_v42, %v133_v42  ;;  %v166_v56 = vmul.f32 %v134_v43, %v134_v43  ;;  %196 = vadd.xlane.f32.xlu1 %v195_v47  ;;  %v147_v62 = vmul.f32 %v115_v50, %v115_v50  ;;  %v96_v0 = vld [vmem:[#allocation7 + $0x18] sm:$0xff]  ;;  %v111_v4 = vsub.f32 %v63_v51, %v79_v52  ;;  %v87_v6 = vld [vmem:[#allocation5 + $0x50] sm:$0xff]  ;;  %v74_v43 = vld [vmem:[#allocation3 + $0x68] sm:$0xff] }
  0x19   :  { %v189_v1 = vadd.f32 %v174_v54, %v173_v53  ;;  %v148_v7 = vmul.f32 %v116_v59, %v116_v59  ;;  %v163_v8 = vmul.f32 %v131_v60, %v131_v60  ;;  %v164_v9 = vmul.f32 %v132_v61, %v132_v61  ;;  %v72_v11 = vld [vmem:[#allocation3 + $0x58] sm:$0xff]  ;;  %v103_v13 = vld [vmem:[#allocation7 + $0x50] sm:$0xff]  ;;  %v106_v50 = vld [vmem:[#allocation7 + $0x68] sm:$0xff] }
  0x1a   :  { %v181_v2 = vsub.f32 %v149_v48, %v165_v55  ;;  %v182_v3 = vsub.f32 %v150_v49, %v166_v56  ;;  %v112_v10 = vsub.f32 %v64_v57, %v80_v58  ;;  %v88_v12 = vld [vmem:[#allocation5 + $0x58] sm:$0xff]  ;;  %v127_v15 = vsub.f32 %v63_v51, %v95_v63  ;;  %v75_v19 = vld [vmem:[#allocation3 + $0x70] sm:$0xff]  ;;  %v90_v48 = vld [vmem:[#allocation5 + $0x68] sm:$0xff] }
  0x1b   :  { %190 = vadd.xlane.f32.xlu0 %v189_v1  ;;  %v128_v16 = vsub.f32 %v64_v57, %v96_v0  ;;  %v143_v17 = vmul.f32 %v111_v4, %v111_v4  ;;  %v104_v18 = vld [vmem:[#allocation7 + $0x58] sm:$0xff]  ;;  %v91_v20 = vld [vmem:[#allocation5 + $0x70] sm:$0xff]  ;;  %v179_v21 = vsub.f32 %v147_v62, %v163_v8  ;;  %v180_v22 = vsub.f32 %v148_v7, %v164_v9  ;;  %v105_v49 = vld [vmem:[#allocation7 + $0x60] sm:$0xff] }
  0x1c   :  { %v201_v14 = vadd.f32 %v182_v3, %v181_v2  ;;  %v144_v23 = vmul.f32 %v112_v10, %v112_v10  ;;  %v119_v24 = vsub.f32 %v71_v5, %v87_v6  ;;  %v76_v25 = vld [vmem:[#allocation3 + $0x78] sm:$0xff]  ;;  %v159_v26 = vmul.f32 %v127_v15, %v127_v15  ;;  %v107_v31 = vld [vmem:[#allocation7 + $0x70] sm:$0xff] }
  0x1d   :  { %v160_v27 = vmul.f32 %v128_v16, %v128_v16  ;;  %v120_v28 = vsub.f32 %v72_v11, %v88_v12  ;;  %v135_v29 = vsub.f32 %v71_v5, %v103_v13  ;;  %v92_v30 = vld [vmem:[#allocation5 + $0x78] sm:$0xff]  ;;  %v198_v33 = vadd.f32 %v180_v22, %v179_v21  ;;  %v228_v9 = vld [vmem:[#allocation2 + $0x10] sm:$0xff]  ;;  %v226_v12 = vld [vmem:[#allocation2] sm:$0xff] }
  0x1e   :  { %202 = vadd.xlane.f32.xlu2 %v201_v14  ;;  %v108_v32 = vld [vmem:[#allocation7 + $0x78] sm:$0xff]  ;;  %v136_v34 = vsub.f32 %v72_v11, %v104_v18  ;;  %v151_v35 = vmul.f32 %v119_v24, %v119_v24  ;;  %v123_v36 = vsub.f32 %v75_v19, %v91_v20  ;;  %v175_v39 = vsub.f32 %v143_v17, %v159_v26  ;;  %v230_v14 = vld [vmem:[#allocation2 + $0x20] sm:$0xff]  ;;  %v227_v21 = vld [vmem:[#allocation2 + $0x8] sm:$0xff] }
  0x1f   :  { %v176_v40 = vsub.f32 %v144_v23, %v160_v27  ;;  %v152_v41 = vmul.f32 %v120_v28, %v120_v28  ;;  %v167_v42 = vmul.f32 %v135_v29, %v135_v29  ;;  %v124_v45 = vsub.f32 %v76_v25, %v92_v30  ;;  %v229_v18 = vld [vmem:[#allocation2 + $0x18] sm:$0xff]  ;;  %v231_v26 = vld [vmem:[#allocation2 + $0x28] sm:$0xff] }
  0x20   :  { %199 = vadd.xlane.f32.xlu1 %v198_v33  ;;  %v168_v44 = vmul.f32 %v136_v34, %v136_v34  ;;  %v139_v46 = vsub.f32 %v75_v19, %v107_v31  ;;  %v140_v47 = vsub.f32 %v76_v25, %v108_v32  ;;  %v155_v53 = vmul.f32 %v123_v36, %v123_v36  ;;  %v233_v31 = vld [vmem:[#allocation2 + $0x38] sm:$0xff] }
  0x21   :  { %v192_v51 = vadd.f32 %v176_v40, %v175_v39  ;;  %v183_v52 = vsub.f32 %v151_v35, %v167_v42  ;;  %v121_v54 = vsub.f32 %v73_v37, %v89_v38  ;;  %v156_v56 = vmul.f32 %v124_v45, %v124_v45  ;;  %v232_v38 = vld [vmem:[#allocation2 + $0x30] sm:$0xff] }
  0x22   :  { %v184_v55 = vsub.f32 %v152_v41, %v168_v44  ;;  %v171_v57 = vmul.f32 %v139_v46, %v139_v46  ;;  %v172_v58 = vmul.f32 %v140_v47, %v140_v47  ;;  %v122_v59 = vsub.f32 %v74_v43, %v90_v48 }
  0x23   :  { %193 = vadd.xlane.f32.xlu0 %v192_v51  ;;  %v137_v60 = vsub.f32 %v73_v37, %v105_v49  ;;  %v138_v61 = vsub.f32 %v74_v43, %v106_v50  ;;  %v153_v62 = vmul.f32 %v121_v54, %v121_v54 }
  0x24   :  { %v204_v63 = vadd.f32 %v184_v55, %v183_v52  ;;  %v187_v0 = vsub.f32 %v155_v53, %v171_v57  ;;  %v188_v1 = vsub.f32 %v156_v56, %v172_v58  ;;  %v154_v2 = vmul.f32 %v122_v59, %v122_v59 }
  0x25   :  { %v169_v3 = vmul.f32 %v137_v60, %v137_v60  ;;  %v170_v4 = vmul.f32 %v138_v61, %v138_v61 }
  0x26   :  { %205 = vadd.xlane.f32.xlu2 %v204_v63  ;;  %v210_v5 = vadd.f32 %v188_v1, %v187_v0 }
  0x27   :  { %v185_v6 = vsub.f32 %v153_v62, %v169_v3  ;;  %v186_v7 = vsub.f32 %v154_v2, %v170_v4 }
  0x28   :  { %211 = vadd.xlane.f32.xlu1 %v210_v5 }
  0x29   :  { %v207_v8 = vadd.f32 %v186_v7, %v185_v6 }
  0x2b   :  { %208 = vadd.xlane.f32.xlu0 %v207_v8 }
  0x8b   :  { %v197_v10 = vpop.xlane.xlu1 %196 }
  0x8c   :  { %v236_v11 = vadd.f32 %v228_v9, %v197_v10 }
  0x8e   :  { %245 = vst.msk [vmem:[#allocation2 + $0x10] sm:$0xff] %vm217_vm0, %v236_v11  ;;  %v191_v13 = vpop.xlane.xlu0 %190 }
  0x8f   :  { %v234_v15 = vadd.f32 %v226_v12, %v191_v13 }
  0x91   :  { %v203_v16 = vpop.xlane.xlu2 %202  ;;  %243 = vst.msk [vmem:[#allocation2] sm:$0xff] %vm217_vm0, %v234_v15 }
  0x92   :  { %v238_v17 = vadd.f32 %v230_v14, %v203_v16 }
  0x93   :  { %v200_v19 = vpop.xlane.xlu1 %199 }
  0x94   :  { %247 = vst.msk [vmem:[#allocation2 + $0x20] sm:$0xff] %vm217_vm0, %v238_v17  ;;  %v237_v20 = vadd.f32 %v229_v18, %v200_v19 }
  0x95   :  { %v256_v22 = vld [vmem:[#allocation2 + $0x10] sm:$0xff] }
  0x96   :  { %v264_v23 = vadd.f32 1.0, %v256_v22  ;;  %246 = vst.msk [vmem:[#allocation2 + $0x18] sm:$0xff] %vm217_vm0, %v237_v20  ;;  %v194_v24 = vpop.xlane.xlu0 %193 }
  0x97   :  { %v235_v25 = vadd.f32 %v227_v21, %v194_v24 }
  0x98   :  { %v272_v27 = vmax.f32 %v264_v23, 0.0  ;;  %v254_v28 = vld [vmem:[#allocation2] sm:$0xff] }
  0x99   :  { %v262_v29 = vadd.f32 1.0, %v254_v28  ;;  %244 = vst.msk [vmem:[#allocation2 + $0x8] sm:$0xff] %vm217_vm0, %v235_v25  ;;  %v206_v30 = vpop.xlane.xlu2 %205 }
  0x9a   :  { %280 = vst.msk [vmem:[%s460_s3 + $0x10] sm:$0xff] %vm217_vm0, %v272_v27  ;;  %v239_v33 = vadd.f32 %v231_v26, %v206_v30 }
  0x9b   :  { %v258_v32 = vld [vmem:[#allocation2 + $0x20] sm:$0xff]  ;;  %v270_v34 = vmax.f32 %v262_v29, 0.0  ;;  %v212_v36 = vpop.xlane.xlu1 %211 }
  0x9c   :  { %v266_v35 = vadd.f32 1.0, %v258_v32  ;;  %248 = vst.msk [vmem:[#allocation2 + $0x28] sm:$0xff] %vm217_vm0, %v239_v33  ;;  %v241_v37 = vadd.f32 %v233_v31, %v212_v36 }
  0x9d   :  { %278 = vst.msk [vmem:[%s460_s3] sm:$0xff] %vm217_vm0, %v270_v34  ;;  %v257_v40 = vld [vmem:[#allocation2 + $0x18] sm:$0xff] }
  0x9e   :  { %v274_v39 = vmax.f32 %v266_v35, 0.0  ;;  %v265_v41 = vadd.f32 1.0, %v257_v40  ;;  %250 = vst.msk [vmem:[#allocation2 + $0x38] sm:$0xff] %vm217_vm0, %v241_v37  ;;  %v209_v42 = vpop.xlane.xlu0 %208 }
  0x9f   :  { %v240_v43 = vadd.f32 %v232_v38, %v209_v42 }
  0xa0   :  { %282 = vst.msk [vmem:[%s460_s3 + $0x20] sm:$0xff] %vm217_vm0, %v274_v39  ;;  %v273_v44 = vmax.f32 %v265_v41, 0.0  ;;  %v255_v45 = vld [vmem:[#allocation2 + $0x8] sm:$0xff] }
  0xa1   :  { %v263_v46 = vadd.f32 1.0, %v255_v45  ;;  %249 = vst.msk [vmem:[#allocation2 + $0x30] sm:$0xff] %vm217_vm0, %v240_v43 }
  0xa2   :  { %281 = vst.msk [vmem:[%s460_s3 + $0x18] sm:$0xff] %vm217_vm0, %v273_v44 }
  0xa3   :  { %v271_v47 = vmax.f32 %v263_v46, 0.0  ;;  %v259_v48 = vld [vmem:[#allocation2 + $0x28] sm:$0xff] }
  0xa4   :  { %v267_v49 = vadd.f32 1.0, %v259_v48 }
  0xa5   :  { %279 = vst.msk [vmem:[%s460_s3 + $0x8] sm:$0xff] %vm217_vm0, %v271_v47  ;;  %v261_v50 = vld [vmem:[#allocation2 + $0x38] sm:$0xff] }
  0xa6   :  { %v275_v51 = vmax.f32 %v267_v49, 0.0  ;;  %v269_v52 = vadd.f32 1.0, %v261_v50 }
  0xa8   :  { %283 = vst.msk [vmem:[%s460_s3 + $0x28] sm:$0xff] %vm217_vm0, %v275_v51  ;;  %v277_v53 = vmax.f32 %v269_v52, 0.0  ;;  %v260_v54 = vld [vmem:[#allocation2 + $0x30] sm:$0xff] }
  0xa9   :  { %v268_v55 = vadd.f32 1.0, %v260_v54 }
  0xaa   :  { %285 = vst.msk [vmem:[%s460_s3 + $0x38] sm:$0xff] %vm217_vm0, %v277_v53 }
  0xab   :  { %v276_v56 = vmax.f32 %v268_v55, 0.0 }
  0xad   :  { %284 = vst.msk [vmem:[%s460_s3 + $0x30] sm:$0xff] %vm217_vm0, %v276_v56 }
  0xae   :  { %290 = vsyncpa [#allocation4], 1 }
  0xaf   :  { %291 = vsyncpa [#allocation6], 1 }

</bundles_post_ra>
